<compile_context>
chip_gen: v7x
topology: tpu7x:2x2x1
jax: 0.10.0
libtpu: 0.0.40
codegen_flags: <defaults>
</compile_context>

<pallas_src>
import jax
import jax.numpy as jnp
from jax.experimental import pallas as pl
from jax.experimental.pallas import tpu as pltpu

LEAKY_SLOPE = 0.01


def _leaky_relu(x, slope=LEAKY_SLOPE):
    return jnp.where(x > 0, x, slope * x)


def _round_up(x, m):
    return ((x + m - 1) // m) * m


def _pad2d(x, rows, cols):
    return jnp.pad(x, ((0, rows - x.shape[0]), (0, cols - x.shape[1])))


def dan_kernel(ids_ref, table_ref, w1_ref, b1_ref, w2_ref, b2_ref, w3_ref, b3_ref,
               out_ref):
    # ids_ref:   (bm, S)   int32  token indices for this batch tile
    # table_ref: (Vp, Dp)  bf16   zero-padded embedding table (VMEM resident)
    # w*/b*:     zero-padded MLP weights/biases (bf16, VMEM resident)
    # out_ref:   (bm, Op)  f32
    bm, S = ids_ref.shape
    Vp = table_ref.shape[0]
    inv_s = 1.0 / float(S)  # compile-time constant; avoids a per-element divide

    ids = ids_ref[...]                                              # (bm, S)
    vocab = jax.lax.broadcasted_iota(jnp.int32, (bm, S, Vp), 2)     # lane-dim iota
    onehot = (ids[:, :, None] == vocab).astype(jnp.float32)         # (bm, S, Vp)
    counts = jnp.sum(onehot, axis=1)                                # (bm, Vp) f32 accumulate

    # Fused gather + mean-pool: counts @ table on the MXU, scaled by 1/S.
    table = table_ref[...].astype(jnp.float32)
    pooled = jnp.dot(counts, table, preferred_element_type=jnp.float32)
    pooled = pooled * jnp.float32(inv_s)                            # (bm, Dp)

    # Dropout is identity at inference.
    # MLP: Linear -> LeakyReLU -> Linear -> LeakyReLU -> Linear (f32 accumulation).
    h1 = jnp.dot(pooled, w1_ref[...].astype(jnp.float32),
                 preferred_element_type=jnp.float32) + b1_ref[...].astype(jnp.float32)
    h1 = _leaky_relu(h1)
    h2 = jnp.dot(h1, w2_ref[...].astype(jnp.float32),
                 preferred_element_type=jnp.float32) + b2_ref[...].astype(jnp.float32)
    h2 = _leaky_relu(h2)
    h3 = jnp.dot(h2, w3_ref[...].astype(jnp.float32),
                 preferred_element_type=jnp.float32) + b3_ref[...].astype(jnp.float32)
    out_ref[...] = h3.astype(out_ref.dtype)


def phrase2vec_dan_forward(token_ids, embed_table, params, *, block_b=None,
                           param_dtype=jnp.bfloat16):
    """token_ids: (B, S) int; embed_table: (V, D).
    params: w1 (D,H1), b1 (1,H1), w2 (H1,H2), b2 (1,H2), w3 (H2,O), b3 (1,O).
    Returns (B, O) float32."""
    token_ids = token_ids.astype(jnp.int32)
    B, S = token_ids.shape
    V, D = embed_table.shape
    H1 = params["w1"].shape[1]
    H2 = params["w2"].shape[1]
    O = params["w3"].shape[1]

    # Zero-pad feature dims to lane width (128) so every matmul tile and output
    # store is full-width; pad the vocab dim so the count matrix is lane-dense.
    Vp, Dp = _round_up(V, 128), _round_up(D, 128)
    H1p, H2p, Op = _round_up(H1, 128), _round_up(H2, 128), _round_up(O, 128)

    table_p = _pad2d(embed_table, Vp, Dp).astype(param_dtype)
    w1p = _pad2d(params["w1"], Dp, H1p).astype(param_dtype)
    b1p = _pad2d(params["b1"], 1, H1p).astype(param_dtype)
    w2p = _pad2d(params["w2"], H1p, H2p).astype(param_dtype)
    b2p = _pad2d(params["b2"], 1, H2p).astype(param_dtype)
    w3p = _pad2d(params["w3"], H2p, Op).astype(param_dtype)
    b3p = _pad2d(params["b3"], 1, Op).astype(param_dtype)

    # Batch tiling: multi-step grid => pipelined ids/out DMA + megacore sharding.
    if block_b is None:
        block_b = min(B, 256)
    assert B % block_b == 0, "B must be divisible by block_b"
    assert block_b % 8 == 0 or block_b == B, "block_b must be a multiple of 8"
    grid = (B // block_b,)

    # VMEM budget: double-buffered ids/out tiles + resident table/weights, with
    # headroom for in-kernel intermediates. Re-derive for real sizes per chip
    # generation (v7x has 64 MiB/TC vs 128 MiB on v5e/v6e).
    itm = jnp.dtype(param_dtype).itemsize
    resident = (Vp * Dp + Dp * H1p + H1p * H2p + H2p * Op + H1p + H2p + Op) * itm
    per_step = 2 * (block_b * S * 4 + block_b * Op * 4)
    vmem_limit = int(min(64 * 2**20, max(16 * 2**20, 2 * (resident + per_step))))

    const = lambda shape: pl.BlockSpec(shape, lambda i: (0,) * len(shape))

    # TODO(synk): for word2vec-scale vocab (V*D too big for VMEM) the resident
    # table / count-matrix pooling must be replaced by an HBM-resident table
    # (memory_space=pl.ANY) with manual per-token DMA gather.
    out = pl.pallas_call(
        dan_kernel,
        out_shape=jax.ShapeDtypeStruct((B, Op), jnp.float32),
        grid_spec=pltpu.PrefetchScalarGridSpec(
            num_scalar_prefetch=0,
            grid=grid,
            in_specs=[
                pl.BlockSpec((block_b, S), lambda i: (i, 0)),   # token ids
                const((Vp, Dp)),                                # embedding table
                const((Dp, H1p)), const((1, H1p)),
                const((H1p, H2p)), const((1, H2p)),
                const((H2p, Op)), const((1, Op)),
            ],
            out_specs=pl.BlockSpec((block_b, Op), lambda i: (i, 0)),
        ),
        compiler_params=pltpu.CompilerParams(
            dimension_semantics=("parallel",),
            vmem_limit_bytes=vmem_limit,
        ),
    )(token_ids, table_p, w1p, b1p, w2p, b2p, w3p, b3p)

    return out[:, :O]


def reference_forward(token_ids, embed_table, params):
    f32 = lambda a: a.astype(jnp.float32)
    hp = jax.lax.Precision.HIGHEST
    emb = jnp.take(f32(embed_table), token_ids, axis=0)
    pooled = jnp.mean(emb, axis=1)
    h = _leaky_relu(jnp.dot(pooled, f32(params["w1"]), precision=hp) + f32(params["b1"]))
    h = _leaky_relu(jnp.dot(h, f32(params["w2"]), precision=hp) + f32(params["b2"]))
    return jnp.dot(h, f32(params["w3"]), precision=hp) + f32(params["b3"])


if __name__ == "__main__":
    # Small, deterministic synthetic setup (no checkpoint load).
    B, S = 16, 8         # batch, padded sequence length (grid has 2 steps w/ block_b=8)
    V = 64               # tiny vocab (includes <OOV>/<PAD> slots)
    D = 32               # embedding dim ("dim")
    H1, H2, O = 64, 64, 32

    key = jax.random.PRNGKey(0)
    k_emb, k_tok, k1, k2, k3 = jax.random.split(key, 5)

    embed_table = jax.random.normal(k_emb, (V, D), dtype=jnp.float32)
    token_ids = jax.random.randint(k_tok, (B, S), 0, V, dtype=jnp.int32)

    def linear_init(k, fan_in, fan_out):
        kw, kb = jax.random.split(k)
        bound = 1.0 / jnp.sqrt(fan_in)
        w = jax.random.uniform(kw, (fan_in, fan_out), jnp.float32, -bound, bound)
        b = jax.random.uniform(kb, (1, fan_out), jnp.float32, -bound, bound)
        return w, b

    w1, b1 = linear_init(k1, D, H1)
    w2, b2 = linear_init(k2, H1, H2)
    w3, b3 = linear_init(k3, H2, O)
    params = dict(w1=w1, b1=b1, w2=w2, b2=b2, w3=w3, b3=b3)

    out = phrase2vec_dan_forward(token_ids, embed_table, params, block_b=8)
    out = jax.block_until_ready(out)

    # Kernel streams bf16 parameters; compare against a reference that uses the
    # SAME bf16-rounded values (then computes in f32) for an apples-to-apples check.
    bf = lambda a: a.astype(jnp.bfloat16)
    params_bf = {k: bf(v) for k, v in params.items()}
    ref = reference_forward(token_ids, bf(embed_table), params_bf)

    assert out.shape == (B, O)
    assert jnp.allclose(out, ref, atol=1e-3, rtol=1e-3), "mismatch vs reference"

    # TODO(synk): nn.Dropout is a no-op at inference; training-mode dropout
    # (pltpu.prng_random_bits masking) is intentionally omitted.
    print("KERNEL_OK")
</pallas_src>

<mosaic_0001>
module attributes {stable_mosaic.version = 11 : i64} {
  func.func @dan_kernel(%arg0: i32, %arg1: memref<8x8xi32, #tpu.memory_space<vmem>>, %arg2: memref<128x128xbf16, #tpu.memory_space<vmem>>, %arg3: memref<128x128xbf16, #tpu.memory_space<vmem>>, %arg4: memref<1x128xbf16, #tpu.memory_space<vmem>>, %arg5: memref<128x128xbf16, #tpu.memory_space<vmem>>, %arg6: memref<1x128xbf16, #tpu.memory_space<vmem>>, %arg7: memref<128x128xbf16, #tpu.memory_space<vmem>>, %arg8: memref<1x128xbf16, #tpu.memory_space<vmem>>, %arg9: memref<8x128xf32, #tpu.memory_space<vmem>>) attributes {dimension_semantics = [#tpu.dimension_semantics<parallel>], iteration_bounds = array<i64: 2>, scalar_prefetch = 0 : i64, scratch_operands = 0 : i64, tpu.core_type = #tpu.core_type<tc>, window_params = [{transform_indices = @transform_0, window_bounds = array<i64: 8, 8>}, {pipeline_mode = #tpu.pipeline_mode<synchronous>, transform_indices = @transform_1, window_bounds = array<i64: 128, 128>}, {pipeline_mode = #tpu.pipeline_mode<synchronous>, transform_indices = @transform_2, window_bounds = array<i64: 128, 128>}, {pipeline_mode = #tpu.pipeline_mode<synchronous>, transform_indices = @transform_3, window_bounds = array<i64: 1, 128>}, {pipeline_mode = #tpu.pipeline_mode<synchronous>, transform_indices = @transform_4, window_bounds = array<i64: 128, 128>}, {pipeline_mode = #tpu.pipeline_mode<synchronous>, transform_indices = @transform_5, window_bounds = array<i64: 1, 128>}, {pipeline_mode = #tpu.pipeline_mode<synchronous>, transform_indices = @transform_6, window_bounds = array<i64: 128, 128>}, {pipeline_mode = #tpu.pipeline_mode<synchronous>, transform_indices = @transform_7, window_bounds = array<i64: 1, 128>}, {transform_indices = @transform_8, window_bounds = array<i64: 8, 128>}]} {
    %c0 = arith.constant 0 : index
    %c0_0 = arith.constant 0 : index
    %0 = vector.load %arg1[%c0, %c0_0] : memref<8x8xi32, #tpu.memory_space<vmem>>, vector<8x8xi32>
    %1 = tpu.iota {dimensions = array<i32: 2>} : vector<8x8x128xi32>
    %2 = vector.shape_cast %0 : vector<8x8xi32> to vector<8x8x1xi32>
    %3 = vector.broadcast %2 : vector<8x8x1xi32> to vector<8x8x128xi32>
    %4 = arith.cmpi eq, %3, %1 : vector<8x8x128xi32>
    %5 = arith.extui %4 : vector<8x8x128xi1> to vector<8x8x128xi32>
    %6 = arith.sitofp %5 : vector<8x8x128xi32> to vector<8x8x128xf32>
    %cst = arith.constant dense<0.000000e+00> : vector<8x128xf32>
    %7 = vector.multi_reduction <add>, %6, %cst [1] : vector<8x8x128xf32> to vector<8x128xf32>
    %c0_1 = arith.constant 0 : index
    %c0_2 = arith.constant 0 : index
    %8 = vector.load %arg2[%c0_1, %c0_2] : memref<128x128xbf16, #tpu.memory_space<vmem>>, vector<128x128xbf16>
    %9 = arith.extf %8 : vector<128x128xbf16> to vector<128x128xf32>
    %cst_3 = arith.constant dense<0.000000e+00> : vector<8x128xf32>
    %10 = tpu.matmul %7, %9, %cst_3 {dimension_numbers = #tpu.dot_dimension_numbers<[1], [0], [0], [1], [0, 0, 1, 1], [], []>} : vector<8x128xf32>, vector<128x128xf32>, vector<8x128xf32> -> vector<8x128xf32>
    %cst_4 = arith.constant 1.250000e-01 : f32
    %11 = vector.broadcast %cst_4 : f32 to vector<8x128xf32>
    %12 = arith.mulf %10, %11 : vector<8x128xf32>
    %c0_5 = arith.constant 0 : index
    %c0_6 = arith.constant 0 : index
    %13 = vector.load %arg3[%c0_5, %c0_6] : memref<128x128xbf16, #tpu.memory_space<vmem>>, vector<128x128xbf16>
    %14 = arith.extf %13 : vector<128x128xbf16> to vector<128x128xf32>
    %cst_7 = arith.constant dense<0.000000e+00> : vector<8x128xf32>
    %15 = tpu.matmul %12, %14, %cst_7 {dimension_numbers = #tpu.dot_dimension_numbers<[1], [0], [0], [1], [0, 0, 1, 1], [], []>} : vector<8x128xf32>, vector<128x128xf32>, vector<8x128xf32> -> vector<8x128xf32>
    %c0_8 = arith.constant 0 : index
    %c0_9 = arith.constant 0 : index
    %16 = vector.load %arg4[%c0_8, %c0_9] : memref<1x128xbf16, #tpu.memory_space<vmem>>, vector<1x128xbf16>
    %17 = arith.extf %16 : vector<1x128xbf16> to vector<1x128xf32>
    %18 = vector.broadcast %17 : vector<1x128xf32> to vector<8x128xf32>
    %19 = arith.addf %15, %18 : vector<8x128xf32>
    %cst_10 = arith.constant 0.000000e+00 : f32
    %20 = vector.broadcast %cst_10 : f32 to vector<8x128xf32>
    %21 = arith.cmpf ogt, %19, %20 : vector<8x128xf32>
    %cst_11 = arith.constant 0.00999999977 : f32
    %22 = vector.broadcast %cst_11 : f32 to vector<8x128xf32>
    %23 = arith.mulf %22, %19 : vector<8x128xf32>
    %24 = arith.select %21, %19, %23 : vector<8x128xi1>, vector<8x128xf32>
    %c0_12 = arith.constant 0 : index
    %c0_13 = arith.constant 0 : index
    %25 = vector.load %arg5[%c0_12, %c0_13] : memref<128x128xbf16, #tpu.memory_space<vmem>>, vector<128x128xbf16>
    %26 = arith.extf %25 : vector<128x128xbf16> to vector<128x128xf32>
    %cst_14 = arith.constant dense<0.000000e+00> : vector<8x128xf32>
    %27 = tpu.matmul %24, %26, %cst_14 {dimension_numbers = #tpu.dot_dimension_numbers<[1], [0], [0], [1], [0, 0, 1, 1], [], []>} : vector<8x128xf32>, vector<128x128xf32>, vector<8x128xf32> -> vector<8x128xf32>
    %c0_15 = arith.constant 0 : index
    %c0_16 = arith.constant 0 : index
    %28 = vector.load %arg6[%c0_15, %c0_16] : memref<1x128xbf16, #tpu.memory_space<vmem>>, vector<1x128xbf16>
    %29 = arith.extf %28 : vector<1x128xbf16> to vector<1x128xf32>
    %30 = vector.broadcast %29 : vector<1x128xf32> to vector<8x128xf32>
    %31 = arith.addf %27, %30 : vector<8x128xf32>
    %cst_17 = arith.constant 0.000000e+00 : f32
    %32 = vector.broadcast %cst_17 : f32 to vector<8x128xf32>
    %33 = arith.cmpf ogt, %31, %32 : vector<8x128xf32>
    %cst_18 = arith.constant 0.00999999977 : f32
    %34 = vector.broadcast %cst_18 : f32 to vector<8x128xf32>
    %35 = arith.mulf %34, %31 : vector<8x128xf32>
    %36 = arith.select %33, %31, %35 : vector<8x128xi1>, vector<8x128xf32>
    %c0_19 = arith.constant 0 : index
    %c0_20 = arith.constant 0 : index
    %37 = vector.load %arg7[%c0_19, %c0_20] : memref<128x128xbf16, #tpu.memory_space<vmem>>, vector<128x128xbf16>
    %38 = arith.extf %37 : vector<128x128xbf16> to vector<128x128xf32>
    %cst_21 = arith.constant dense<0.000000e+00> : vector<8x128xf32>
    %39 = tpu.matmul %36, %38, %cst_21 {dimension_numbers = #tpu.dot_dimension_numbers<[1], [0], [0], [1], [0, 0, 1, 1], [], []>} : vector<8x128xf32>, vector<128x128xf32>, vector<8x128xf32> -> vector<8x128xf32>
    %c0_22 = arith.constant 0 : index
    %c0_23 = arith.constant 0 : index
    %40 = vector.load %arg8[%c0_22, %c0_23] : memref<1x128xbf16, #tpu.memory_space<vmem>>, vector<1x128xbf16>
    %41 = arith.extf %40 : vector<1x128xbf16> to vector<1x128xf32>
    %42 = vector.broadcast %41 : vector<1x128xf32> to vector<8x128xf32>
    %43 = arith.addf %39, %42 : vector<8x128xf32>
    %c0_24 = arith.constant 0 : index
    %c0_25 = arith.constant 0 : index
    %44 = vector.load %arg9[%c0_24, %c0_25] : memref<8x128xf32, #tpu.memory_space<vmem>>, vector<8x128xf32>
    tpu.vector_store %arg9[%c0_24, %c0_25], %43 {strides = array<i32>} : memref<8x128xf32, #tpu.memory_space<vmem>>, vector<8x128xf32>,
    return
  }
  func.func @transform_0(%arg0: i32) -> (i32, i32) {
    %c0_i32 = arith.constant 0 : i32
    %c0_i32_0 = arith.constant 0 : i32
    return %arg0, %c0_i32 : i32, i32
  }
  func.func @transform_1(%arg0: i32) -> (i32, i32) {
    %c0_i32 = arith.constant 0 : i32
    %c0_i32_0 = arith.constant 0 : i32
    %c0_i32_1 = arith.constant 0 : i32
    return %c0_i32, %c0_i32_0 : i32, i32
  }
  func.func @transform_2(%arg0: i32) -> (i32, i32) {
    %c0_i32 = arith.constant 0 : i32
    %c0_i32_0 = arith.constant 0 : i32
    %c0_i32_1 = arith.constant 0 : i32
    return %c0_i32, %c0_i32_0 : i32, i32
  }
  func.func @transform_3(%arg0: i32) -> (i32, i32) {
    %c0_i32 = arith.constant 0 : i32
    %c0_i32_0 = arith.constant 0 : i32
    %c0_i32_1 = arith.constant 0 : i32
    return %c0_i32, %c0_i32_0 : i32, i32
  }
  func.func @transform_4(%arg0: i32) -> (i32, i32) {
    %c0_i32 = arith.constant 0 : i32
    %c0_i32_0 = arith.constant 0 : i32
    %c0_i32_1 = arith.constant 0 : i32
    return %c0_i32, %c0_i32_0 : i32, i32
  }
  func.func @transform_5(%arg0: i32) -> (i32, i32) {
    %c0_i32 = arith.constant 0 : i32
    %c0_i32_0 = arith.constant 0 : i32
    %c0_i32_1 = arith.constant 0 : i32
    return %c0_i32, %c0_i32_0 : i32, i32
  }
  func.func @transform_6(%arg0: i32) -> (i32, i32) {
    %c0_i32 = arith.constant 0 : i32
    %c0_i32_0 = arith.constant 0 : i32
    %c0_i32_1 = arith.constant 0 : i32
    return %c0_i32, %c0_i32_0 : i32, i32
  }
  func.func @transform_7(%arg0: i32) -> (i32, i32) {
    %c0_i32 = arith.constant 0 : i32
    %c0_i32_0 = arith.constant 0 : i32
    %c0_i32_1 = arith.constant 0 : i32
    return %c0_i32, %c0_i32_0 : i32, i32
  }
  func.func @transform_8(%arg0: i32) -> (i32, i32) {
    %c0_i32 = arith.constant 0 : i32
    %c0_i32_0 = arith.constant 0 : i32
    return %arg0, %c0_i32 : i32, i32
  }
}

</mosaic_0001>

<bundles_post_ra>
// kernel: tpu_custom_call.1
= control target key start
LH: loop header
LB: loop body
LE: loop exit
PB: predicated region body
PF: predicated region fallthrough
CT: control target
= control target key end

     0   :  { %13 = vsyncpa [#allocation3], 0  ;;  %s2176_s0 = inlined_call_operand.vmem [shape: s32[16,8], index: 0, kind: input, shape index: {}]   ;;  %s2177_s1 = inlined_call_operand.hbm [shape: bf16[128,128], index: 1, kind: input, shape index: {}]   ;;  %s2178_s2 = inlined_call_operand.hbm [shape: bf16[128,128], index: 2, kind: input, shape index: {}]   ;;  %s2179_s3 = inlined_call_operand.vmem [shape: bf16[1,128], index: 3, kind: input, shape index: {}]   ;;  %s2180_s4 = inlined_call_operand.hbm [shape: bf16[128,128], index: 4, kind: input, shape index: {}]   ;;  %s2181_s5 = inlined_call_operand.vmem [shape: bf16[1,128], index: 5, kind: input, shape index: {}]   ;;  %s2182_s6 = inlined_call_operand.hbm [shape: bf16[128,128], index: 6, kind: input, shape index: {}]   ;;  %s2183_s7 = inlined_call_operand.vmem [shape: bf16[1,128], index: 7, kind: input, shape index: {}]   ;;  %s2184_s8 = inlined_call_operand.hbm [shape: f32[16,128], index: 8, kind: output, shape index: {}]  }
   0x1   :  { %14 = vsyncpa [#allocation6], 0 }
   0x2   :  { %15 = vsyncpa [#allocation9], 0 }
   0x3   :  { %16 = vsyncpa [#allocation4], 0 }
   0x4   :  { %18 = vsyncpa [#allocation4 + $0x1], 0  ;;  %s1876_s27 = smov 0   ;;  %s1878_s28 = smov 0  }
   0x5   :  { %s1880_s29 = smov 0   ;;  %s1882_s30 = smov 0  }
   0x6 LB: > { %2192 = sst [smem:[#allocation15_spill]] %s1815_s29  ;;  %s1897_s9 = sadd.s32 4294967295, %s1819_s30   ;;  %s1819_s30 = sphi %s1882_s30, %s2211_s30   ;;  %s1815_s29 = sphi %s1880_s29, %s2216_s29   ;;  %s1811_s28 = sphi %s1878_s28, %s2215_s28   ;;  %s1807_s27 = sphi %s1876_s27, %s2214_s27  }
   0x7   : > { %s1062_s10 = sadd.s32 4294967294, %s1819_s30   ;;  %s1901_s11 = sadd.s32 1, %s1819_s30  }
   0x8   : > { %2193 = sst [smem:[#allocation16_spill]] %s1901_s11  ;;  %s204_s12 = sadd.s32 1, %s1815_s29 }
   0x9   : > { %s201_s13 = ssub.s32 %s1819_s30, %s1901_s11  ;;  %p214_p0 = scmp.ne.s32.totalorder %s1815_s29, %s1811_s28 }
   0xa   : > { %p202_p1 = scmp.eq.s32.totalorder %s201_s13, 0  ;;  %p215_p2 = scmp.eq.s32.totalorder %s1897_s9, 1 }
   0xb   : > { %p220_p3 = scmp.ne.s32.totalorder %s1811_s28, %s1807_s27  ;;  %p221_p4 = scmp.eq.s32.totalorder %s1062_s10, 1 }
   0xc   : > { %s1912_s14 = scalar_select %p202_p1, %s1815_s29, %s204_s12  }
   0xd   : > { %p1914_p5 = por %p215_p2, %p214_p0  ;;  %p1918_p6 = por %p221_p4, %p220_p3 }
   0xe   : > { %2194 = sst [smem:[#allocation17_spill]] %s1912_s14  ;;  %p1063_p7 = scmp.ge.s32.totalorder %s1819_s30, 1 }
   0xf   : > { %s2195_s15 = scalar_select %p1914_p5, 1, 0 }
  0x10   : > { %s2196_s16 = scalar_select %p1918_p6, 1, 0 }
  0x11   : > { %p228_p8 = scmp.lt.s32.totalorder %s1819_s30, 3  ;;  %p2185_p9 = scmp.eq.s32.totalorder %s1897_s9, 0 }
  0x12   : > { %2197 = sst [smem:[#allocation18_spill]] %s2196_s16  ;;  %s1821_s18 = smov [#allocation5]  }
  0x13   : > { %p1925_p10 = pnand %p1063_p7, %p228_p8  ;;  %s253_s19 = sshll.u32 %s1821_s18, 4  ;;  %s1931_s19 = int_to_ptr.vmem [resolvable:$true] %s253_s19 }
  0x14   : > { %s1822_s21 = smov [#allocation2]   ;;  %s1823_s23 = smov [#allocation7]  }
  0x15   : > { %s2198_s17 = scalar_select %p1925_p10, 1, 0 }
  0x16   : > { %p1566_p11 = pneg %p1925_p10  ;;  %s240_s22 = sshll.u32 %s1822_s21, 4  ;;  %s1939_s22 = int_to_ptr.vmem [resolvable:$true] %s240_s22 }
  0x17   : > { %s1941_s24 = sshll.u32 %s1823_s23, 4  ;;  %s1633_s10 = scalar_lea.hbm %s2178_s2, 1024  ;;  %s270_s24 = int_to_ptr.vmem [resolvable:$true] %s1941_s24 }
  0x18   : > { %p1935_p12 = pnand %p2185_p9, %p1566_p11  ;;  %p1634_p13 = scmp.ne.s32.totalorder %s2178_s2, %s1633_s10 }
  0x19   : > { %p1640_p3 = scmp.lt.u32.totalorder %s1633_s10, %s2178_s2 }
  0x1a   : > { %p1951_p0 = pneg %p1935_p12 }
  0x1c   : > { %p1636_p1 = pnand %p1951_p0, %p1634_p13 }
  0x1e   : > { %p1637_p2 = pneg %p1636_p1 }
  0x20   : > { %p1642_p4 = pnand %p1640_p3, %p1637_p2 }
  0x22   : > { %1645 = shalt.err (!%p1642_p4)
}
  0x23   : > { %s1646_s25 = scalar_lea.vmem %s1931_s19, 1024  ;;  %p1654_p9 = scmp.lt.s32.totalorder %s1931_s19, %s1931_s19 }
  0x24   : > { %p1647_p7 = scmp.ne.s32.totalorder %s1931_s19, %s1646_s25  ;;  %p1655_p6 = scmp.lt.s32.totalorder %s1646_s25, %s1646_s25 }
  0x26   : > { %p1649_p8 = pnand %p1647_p7, %p1951_p0  ;;  %p1656_p13 = por %p1655_p6, %p1654_p9 }
  0x28   : > { %p1650_p11 = pneg %p1649_p8 }
  0x2a   : > { %p1657_p1 = pnand %p1656_p13, %p1650_p11 }
  0x2c   : > { %1660 = shalt.err (!%p1657_p1)
}
  0x2d   : > { %s1824_s26 = smov 64   ;;  %s1825_s10 = smov 4  }
  0x2e   : > { %1572 = dma.hbm_to_vmem [thread:$0]  (!%p1935_p12), %s2178_s2, 1024, %s1931_s19, [#allocation6], %s1824_s26, %s1824_s26, %s1825_s10  }
  0x2f   : > { %s1661_s25 = scalar_lea.hbm %s2177_s1, 1024 }
  0x30   : > { %p1662_p6 = scmp.ne.s32.totalorder %s2177_s1, %s1661_s25  ;;  %p1668_p3 = scmp.lt.u32.totalorder %s1661_s25, %s2177_s1 }
  0x32   : > { %p1664_p9 = pnand %p1662_p6, %p1951_p0 }
  0x34   : > { %p1665_p2 = pneg %p1664_p9 }
  0x36   : > { %p1670_p4 = pnand %p1668_p3, %p1665_p2 }
  0x38   : > { %1673 = shalt.err (!%p1670_p4)
}
  0x39   : > { %s1674_s19 = scalar_lea.vmem %s1939_s22, 1024  ;;  %p1682_p13 = scmp.lt.s32.totalorder %s1939_s22, %s1939_s22 }
  0x3a   : > { %p1675_p7 = scmp.ne.s32.totalorder %s1939_s22, %s1674_s19  ;;  %p1683_p1 = scmp.lt.s32.totalorder %s1674_s19, %s1674_s19 }
  0x3c   : > { %p1677_p8 = pnand %p1675_p7, %p1951_p0  ;;  %p1684_p6 = por %p1683_p1, %p1682_p13 }
  0x3e   : > { %p1678_p11 = pneg %p1677_p8 }
  0x40   : > { %p1685_p9 = pnand %p1684_p6, %p1678_p11 }
  0x42   : > { %1688 = shalt.err (!%p1685_p9)
}
  0x43   : > { %1569 = dma.hbm_to_vmem [thread:$0]  (!%p1935_p12), %s2177_s1, 1024, %s1939_s22, [#allocation3], %s1824_s26, %s1824_s26, %s1825_s10  }
  0x44   : > { %s1689_s12 = scalar_lea.hbm %s2180_s4, 1024 }
  0x45   : > { %p1690_p2 = scmp.ne.s32.totalorder %s2180_s4, %s1689_s12  ;;  %p1696_p7 = scmp.lt.u32.totalorder %s1689_s12, %s2180_s4 }
  0x47   : > { %p1692_p3 = pnand %p1690_p2, %p1951_p0 }
  0x49   : > { %p1693_p4 = pneg %p1692_p3 }
  0x4b   : > { %p1698_p8 = pnand %p1696_p7, %p1693_p4 }
  0x4d   : > { %1701 = shalt.err (!%p1698_p8)
}
  0x4e   : > { %s1702_s19 = scalar_lea.vmem %s270_s24, 1024  ;;  %p1710_p6 = scmp.lt.s32.totalorder %s270_s24, %s270_s24 }
  0x4f   : > { %p1703_p11 = scmp.ne.s32.totalorder %s270_s24, %s1702_s19  ;;  %p1711_p9 = scmp.lt.s32.totalorder %s1702_s19, %s1702_s19 }
  0x51   : > { %p1705_p13 = pnand %p1703_p11, %p1951_p0  ;;  %p1712_p5 = por %p1711_p9, %p1710_p6 }
  0x53   : > { %p1706_p1 = pneg %p1705_p13 }
  0x55   : > { %p1713_p10 = pnand %p1712_p5, %p1706_p1 }
  0x57   : > { %1716 = shalt.err (!%p1713_p10)
}
  0x58   : > { %1575 = dma.hbm_to_vmem [thread:$0]  (!%p1935_p12), %s2180_s4, 1024, %s270_s24, [#allocation6], %s1824_s26, %s1824_s26, %s1825_s10  }
  0x59   : > { %s1826_s11 = smov [#allocation8]   ;;  %s1717_s13 = scalar_lea.hbm %s2182_s6, 1024 }
  0x5a   : > { %s285_s14 = sshll.u32 %s1826_s11, 4  ;;  %p1718_p5 = scmp.ne.s32.totalorder %s2182_s6, %s1717_s13  ;;  %s286_s14 = int_to_ptr.vmem [resolvable:$true] %s285_s14 }
  0x5b   : > { %p1724_p3 = scmp.lt.u32.totalorder %s1717_s13, %s2182_s6 }
  0x5c   : > { %p1720_p10 = pnand %p1718_p5, %p1951_p0 }
  0x5e   : > { %p1721_p2 = pneg %p1720_p10 }
  0x60   : > { %p1726_p4 = pnand %p1724_p3, %p1721_p2 }
  0x62   : > { %1729 = shalt.err (!%p1726_p4)
}
  0x63   : > { %s1730_s24 = scalar_lea.vmem %s286_s14, 1024  ;;  %p1738_p13 = scmp.lt.s32.totalorder %s286_s14, %s286_s14 }
  0x64   : > { %p1731_p7 = scmp.ne.s32.totalorder %s286_s14, %s1730_s24  ;;  %p1739_p1 = scmp.lt.s32.totalorder %s1730_s24, %s1730_s24 }
  0x66   : > { %p1733_p8 = pnand %p1731_p7, %p1951_p0  ;;  %p1740_p6 = por %p1739_p1, %p1738_p13 }
  0x68   : > { %p1734_p11 = pneg %p1733_p8 }
  0x6a   : > { %p1741_p9 = pnand %p1740_p6, %p1734_p11 }
  0x6c   : > { %1744 = shalt.err (!%p1741_p9)
}
  0x6d   : > { %1578 = dma.hbm_to_vmem [thread:$0]  (!%p1935_p12), %s2182_s6, 1024, %s286_s14, [#allocation9], %s1824_s26, %s1824_s26, %s1825_s10  }
  0x6e   : > { %p2201_p5 = scmp.ne.s32.totalorder %s2198_s17, 0 }
  0x6f   : > { %p2202_p0 = scmp.eq.s32.totalorder (!%p2201_p5), %s1897_s9, 0 }
  0x70   : > { %311 = sbr.rel (%p2201_p5) target bundleno = 1154 (0x482), region = 52 }
  0x77   : > { %1790 = dma.done.wait (%p2202_p0), [#allocation3], 1024   ;;  %p2203_p10 = pmov %p2202_p0 }
  0x78   : > { %p2204_p2 = pmov %p2202_p0 }
  0x79   : > { %1792 = vsyncadd (%p2203_p10), [#allocation3], 4294966272 }
  0x7a   : > { %1794 = dma.done.wait (%p2204_p2), [#allocation6], 2048   ;;  %p2205_p3 = pmov %p2202_p0 }
  0x7b   : > { %p2206_p4 = pmov %p2202_p0 }
  0x7c   : > { %1796 = vsyncadd (%p2205_p3), [#allocation6], 4294965248 }
  0x7d   : > { %1798 = dma.done.wait (%p2206_p4), [#allocation9], 1024   ;;  %p2207_p12 = pmov %p2202_p0 }
  0x7e   : > { %p356_p7 = scmp.lt.s32.totalorder %s1897_s9, 1  ;;  %v361_v0 = vlaneseq  ;;  %v1827_v1 = vmov 0.0|0.0   ;;  %v1089_v8 = vld [vmem:[#allocation2] sm:$0xff]   ;;  %v1216_v11 = vld [vmem:[#allocation2 + $0x8] sm:$0xff]   ;;  %v1217_v16 = vld [vmem:[#allocation2 + $0x10] sm:$0xff]   ;;  %vm1828_vm0 = vmmov 0  }
  0x7f   : > { %1800 = vsyncadd (%p2207_p12), [#allocation9], 4294966272  ;;  %1452 = vmatprep.subr.bf16.mxu0 %v1827_v1  ;;  %1476 = vmatprep.subr.bf16.mxu1 %v1827_v1  ;;  %v1218_v21 = vld [vmem:[#allocation2 + $0x18] sm:$0xff]   ;;  %v1219_v24 = vld [vmem:[#allocation2 + $0x20] sm:$0xff]   ;;  %v1829_v25 = vmov 0.0   ;;  %vm531_vm7 = vcmask 1041409  }
  0x80   : > { %s357_s17 = scalar_select %p356_p7, %s1897_s9, 1  ;;  %v364_v2 = vshrl.u32 %v361_v0, 7  ;;  %1454 = vmatpush3.bf16.msra.mxu0 %v1089_v8  ;;  %1344 = vmatprep.mubr.msk.f32.mxu0 %vm1828_vm0, %v1829_v25  ;;  %v1220_v26 = vld [vmem:[#allocation2 + $0x28] sm:$0xff]   ;;  %v1121_v27 = vld [vmem:[#allocation5] sm:$0xff]   ;;  %v1221_v29 = vld [vmem:[#allocation2 + $0x30] sm:$0xff]   ;;  %v362_v36 = vand.u32 127, %v361_v0 }
  0x81   : > { %1455 = vmatprep.subr.bf16.mxu0 %v1827_v1  ;;  %1379 = vmatprep.mubr.msk.f32.mxu1 %vm1828_vm0, %v1829_v25  ;;  %v1223_v28 = vld [vmem:[#allocation5 + $0x8] sm:$0xff]   ;;  %v1224_v30 = vld [vmem:[#allocation5 + $0x10] sm:$0xff]   ;;  %v1222_v31 = vld [vmem:[#allocation2 + $0x38] sm:$0xff]   ;;  %vm533_vm10 = vcmask 1042434   ;;  %vm535_vm11 = vcmask 1043459   ;;  %vm537_vm12 = vcmask 1044484  }
  0x82   : > { %s1075_s20 = sshll.u32 %s357_s17, 3  ;;  %v379_v3 = vsub.s32 2, %v364_v2  ;;  %v2063_v4 = vsub.s32 0, %v364_v2  ;;  %v386_v5 = vsub.s32 3, %v364_v2  ;;  %v372_v6 = vsub.s32 1, %v364_v2  ;;  %1478 = vmatpush3.bf16.msra.mxu1 %v1121_v27  ;;  %v1225_v32 = vld [vmem:[#allocation5 + $0x18] sm:$0xff]  }
  0x83   : > { %s359_s10 = scalar_lea.vmem %s2176_s0, %s1075_s20  ;;  %v400_v14 = vsub.s32 5, %v364_v2  ;;  %v393_v15 = vsub.s32 4, %v364_v2  ;;  %v414_v19 = vsub.s32 7, %v364_v2  ;;  %v407_v20 = vsub.s32 6, %v364_v2  ;;  %1479 = vmatprep.subr.bf16.mxu1 %v1827_v1  ;;  %v1226_v33 = vld [vmem:[#allocation5 + $0x20] sm:$0xff]   ;;  %v1227_v34 = vld [vmem:[#allocation5 + $0x28] sm:$0xff]  }
  0x84   : > { %v360_v7 = vld [vmem:[%s359_s10] sm:$0xff]  ;;  %1457 = vmatpush3.bf16.msra.mxu0 %v1216_v11  ;;  %v1228_v35 = vld [vmem:[#allocation5 + $0x30] sm:$0xff]   ;;  %vm539_vm13 = vcmask 1045509   ;;  %vm541_vm14 = vcmask 1046534   ;;  %vm543_vm15 = vcmask 1047559   ;;  %s353_s13 = sand.u32 1, %s1811_s28  }
  0x85   : > { %v380_v9 = vrot.slane %v360_v7, %v379_v3  ;;  %v366_v10 = vrot.slane %v360_v7, %v2063_v4  ;;  %v387_v12 = vrot.slane %v360_v7, %v386_v5  ;;  %v373_v13 = vrot.slane %v360_v7, %v372_v6  ;;  %1458 = vmatprep.subr.bf16.mxu0 %v1827_v1  ;;  %s1074_s25 = sshll.u32 %s353_s13, 3  ;;  %s1085_s19 = sshll.u32 %s1897_s9, 7 }
  0x86   : > { %v401_v17 = vrot.slane %v360_v7, %v400_v14  ;;  %v394_v18 = vrot.slane %v360_v7, %v393_v15  ;;  %v415_v22 = vrot.slane %v360_v7, %v414_v19  ;;  %v408_v23 = vrot.slane %v360_v7, %v407_v20  ;;  %1481 = vmatpush3.bf16.msra.mxu1 %v1223_v28  ;;  %s355_s24 = scalar_lea.vmem [#allocation10], %s1074_s25  ;;  %s2134_s20 = scalar_lea.hbm %s2184_s8, %s1085_s19 }
  0x87   : > { %382 = vbcast.lane.b32.xlu1 %v380_v9, 256  ;;  %368 = vbcast.lane.b32.xlu0 %v366_v10, 256  ;;  %s962_s22 = sshll.u32 %s355_s24, 4  ;;  %s949_s18 = scalar_lea.sflag [#allocation4], %s353_s13  ;;  %s2136_s22 = int_to_ptr.vmem [resolvable:$true] %s962_s22 }
  0x88   : > { %1460 = vmatpush3.bf16.msra.mxu0 %v1217_v16  ;;  %1482 = vmatprep.subr.bf16.mxu1 %v1827_v1  ;;  %s1745_s26 = scalar_lea.vmem %s2136_s22, 128  ;;  %p2208_p11 = scmp.ne.s32.totalorder %s2195_s15, 0 }
  0x89   : > { %1461 = vmatprep.subr.bf16.mxu0 %v1827_v1  ;;  %p1746_p8 = scmp.ne.s32.totalorder %s2136_s22, %s1745_s26  ;;  %s1830_s9 = smov [#allocation10]  }
  0x8a   : > { %1484 = vmatpush3.bf16.msra.mxu1 %v1224_v30  ;;  %s1749_s10 = sshll.u32 %s1830_s9, 4  ;;  %s1750_s10 = int_to_ptr.vmem [resolvable:$false] %s1749_s10 }
  0x8b   : > { %389 = vbcast.lane.b32.xlu1 %v387_v12, 256  ;;  %375 = vbcast.lane.b32.xlu0 %v373_v13, 256  ;;  %p1747_p13 = pnand %p1746_p8, %p2208_p11  ;;  %s1751_s11 = scalar_lea.vmem %s1750_s10, 256 }
  0x8c   : > { %1463 = vmatpush3.bf16.msra.mxu0 %v1218_v21  ;;  %1485 = vmatprep.subr.bf16.mxu1 %v1827_v1  ;;  %p1752_p6 = scmp.lt.s32.totalorder %s2136_s22, %s1750_s10  ;;  %p1753_p9 = scmp.lt.s32.totalorder %s1751_s11, %s1745_s26 }
  0x8d   : > { %1464 = vmatprep.subr.bf16.mxu0 %v1827_v1  ;;  %p1748_p1 = pneg %p1747_p13 }
  0x8e   : > { %1487 = vmatpush3.bf16.msra.mxu1 %v1225_v32  ;;  %p1754_p5 = por %p1753_p9, %p1752_p6 }
  0x8f   : > { %403 = vbcast.lane.b32.xlu1 %v401_v17, 256  ;;  %396 = vbcast.lane.b32.xlu0 %v394_v18, 256 }
  0x90   : > { %1466 = vmatpush3.bf16.msra.mxu0 %v1219_v24  ;;  %1488 = vmatprep.subr.bf16.mxu1 %v1827_v1  ;;  %p1755_p0 = pnand %p1754_p5, %p1748_p1 }
  0x91   : > { %1467 = vmatprep.subr.bf16.mxu0 %v1827_v1 }
  0x92   : > { %1490 = vmatpush3.bf16.msra.mxu1 %v1226_v33 }
  0x93   : > { %417 = vbcast.lane.b32.xlu1 %v415_v22, 256  ;;  %410 = vbcast.lane.b32.xlu0 %v408_v23, 256 }
  0x94   : > { %1469 = vmatpush3.bf16.msra.mxu0 %v1220_v26  ;;  %1491 = vmatprep.subr.bf16.mxu1 %v1827_v1 }
  0x95   : > { %1470 = vmatprep.subr.bf16.mxu0 %v1827_v1 }
  0x96   : > { %1493 = vmatpush3.bf16.msra.mxu1 %v1227_v34 }
  0x97   : > { %1494 = vmatprep.subr.bf16.mxu1 %v1827_v1 }
  0x98   : > { %1472 = vmatpush3.bf16.msra.mxu0 %v1221_v29 }
  0x99   : > { %1473 = vmatprep.subr.bf16.mxu0 %v1827_v1 }
  0x9a   : > { %1496 = vmatpush3.bf16.msra.mxu1 %v1228_v35 }
  0x9b   : > { %1497 = vmatprep.subr.bf16.mxu1 %v1827_v1 }
  0x9c   : > { %1475 = vmatpush3.bf16.msra.mxu0 %v1222_v31 }
  0x9d   : > { %1500 = vmatprep.subr.bf16.mxu0 %v1827_v1 }
  0xf9   : > { %v383_v37 = vpop.permute.xlu1 %382  ;;  %v369_v38 = vpop.permute.xlu0 %368 }
  0xfa   : > { %vm421_vm1 = vcmp.eq.s32.totalorder %v383_v37, %v362_v36  ;;  %vm419_vm2 = vcmp.eq.s32.totalorder %v369_v38, %v362_v36 }
  0xfb   : > { %v1078_v39 = vsel %vm421_vm1, 1.0, %v1829_v25  ;;  %v1076_v40 = vsel %vm419_vm2, 1.0, %v1829_v25 }
  0xfc   : > { %v455_v41 = vrot.slane %v1078_v39, 4  ;;  %v443_v42 = vrot.slane %v1076_v40, 4 }
  0xfd   : > { %v390_v43 = vpop.permute.xlu1 %389  ;;  %v376_v44 = vpop.permute.xlu0 %375 }
  0xfe   : > { %v456_v45 = vadd.f32 %v1078_v39, %v455_v41  ;;  %v444_v46 = vadd.f32 %v1076_v40, %v443_v42  ;;  %vm422_vm3 = vcmp.eq.s32.totalorder %v390_v43, %v362_v36  ;;  %vm420_vm4 = vcmp.eq.s32.totalorder %v376_v44, %v362_v36 }
  0xff   : > { %v1079_v47 = vsel %vm422_vm3, 1.0, %v1829_v25  ;;  %v1077_v48 = vsel %vm420_vm4, 1.0, %v1829_v25 }
 0x100   : > { %v457_v49 = vrot.slane %v456_v45, 2  ;;  %v445_v50 = vrot.slane %v444_v46, 2  ;;  %v461_v51 = vrot.slane %v1079_v47, 4  ;;  %v449_v52 = vrot.slane %v1077_v48, 4 }
 0x101   : > { %v404_v53 = vpop.permute.xlu1 %403  ;;  %v397_v54 = vpop.permute.xlu0 %396 }
 0x102   : > { %v446_v55 = vadd.f32 %v445_v50, %v444_v46  ;;  %v462_v56 = vadd.f32 %v1079_v47, %v461_v51  ;;  %v450_v57 = vadd.f32 %v1077_v48, %v449_v52  ;;  %vm424_vm5 = vcmp.eq.s32.totalorder %v404_v53, %v362_v36  ;;  %v1229_v47 = vld [vmem:[#allocation5 + $0x38] sm:$0xff]   ;;  %v1153_v48 = vld [vmem:[#allocation7] sm:$0xff]   ;;  %v1231_v50 = vld [vmem:[#allocation7 + $0x10] sm:$0xff]  }
 0x103   : > { %vm423_vm6 = vcmp.eq.s32.totalorder %v397_v54, %v362_v36  ;;  %v458_v58 = vadd.f32 %v457_v49, %v456_v45  ;;  %v1081_v61 = vsel %vm424_vm5, 1.0, %v1829_v25  ;;  %1499 = vmatpush3.bf16.msra.mxu1 %v1229_v47  ;;  %v1230_v49 = vld [vmem:[#allocation7 + $0x8] sm:$0xff]   ;;  %v1232_v51 = vld [vmem:[#allocation7 + $0x18] sm:$0xff]   ;;  %v1233_v52 = vld [vmem:[#allocation7 + $0x20] sm:$0xff]  }
 0x104   : > { %v463_v59 = vrot.slane %v462_v56, 2  ;;  %v451_v60 = vrot.slane %v450_v57, 2  ;;  %v1080_v62 = vsel %vm423_vm6, 1.0, %v1829_v25  ;;  %v447_v2 = vrot.slane %v446_v55, 1  ;;  %1524 = vmatprep.subr.bf16.mxu1 %v1827_v1  ;;  %v1234_v53 = vld [vmem:[#allocation7 + $0x28] sm:$0xff]   ;;  %v1235_v54 = vld [vmem:[#allocation7 + $0x30] sm:$0xff]  }
 0x105   : > { %v418_v63 = vpop.permute.xlu1 %417  ;;  %v411_v0 = vpop.permute.xlu0 %410  ;;  %v473_v6 = vrot.slane %v1081_v61, 4  ;;  %v467_v7 = vrot.slane %v1080_v62, 4  ;;  %v459_v8 = vrot.slane %v458_v58, 1 }
 0x106   : > { %v464_v3 = vadd.f32 %v463_v59, %v462_v56  ;;  %v452_v5 = vadd.f32 %v451_v60, %v450_v57  ;;  %vm426_vm8 = vcmp.eq.s32.totalorder %v418_v63, %v362_v36  ;;  %vm425_vm9 = vcmp.eq.s32.totalorder %v411_v0, %v362_v36  ;;  %v1185_v59 = vld [vmem:[#allocation8] sm:$0xff]   ;;  %v1237_v60 = vld [vmem:[#allocation8 + $0x8] sm:$0xff]   ;;  %v1242_v0 = vld [vmem:[#allocation8 + $0x30] sm:$0xff]  }
 0x107   : > { %v1083_v10 = vsel %vm426_vm8, 1.0, %v1829_v25  ;;  %v1082_v11 = vsel %vm425_vm9, 1.0, %v1829_v25  ;;  %v474_v12 = vadd.f32 %v1081_v61, %v473_v6  ;;  %v468_v13 = vadd.f32 %v1080_v62, %v467_v7  ;;  %v1238_v61 = vld [vmem:[#allocation8 + $0x10] sm:$0xff]   ;;  %v1239_v62 = vld [vmem:[#allocation8 + $0x18] sm:$0xff]   ;;  %v1240_v63 = vld [vmem:[#allocation8 + $0x20] sm:$0xff]  }
 0x108   : > { %v453_v9 = vrot.slane %v452_v5, 1  ;;  %v485_v14 = vrot.slane %v1083_v10, 4  ;;  %v479_v15 = vrot.slane %v1082_v11, 4  ;;  %v448_v16 = vadd.f32 %v447_v2, %v446_v55  ;;  %v649_v2 = vld [vmem:[%s2179_s3] sm:$0x1] }
 0x109   : > { %v465_v17 = vrot.slane %v464_v3, 1  ;;  %v475_v19 = vrot.slane %v474_v12, 2  ;;  %v469_v20 = vrot.slane %v468_v13, 2  ;;  %v460_v23 = vadd.f32 %v459_v8, %v458_v58  ;;  %v1236_v58 = vld [vmem:[#allocation7 + $0x38] sm:$0xff]  }
 0x10a   : > { %v454_v18 = vadd.f32 %v453_v9, %v452_v5  ;;  %v486_v21 = vadd.f32 %v1083_v10, %v485_v14  ;;  %v480_v22 = vadd.f32 %v1082_v11, %v479_v15  ;;  %v1243_v11 = vld [vmem:[#allocation8 + $0x38] sm:$0xff]  }
 0x10b   : > { %v476_v26 = vadd.f32 %v475_v19, %v474_v12  ;;  %v470_v27 = vadd.f32 %v469_v20, %v468_v13  ;;  %v466_v30 = vadd.f32 %v465_v17, %v464_v3  ;;  %v650_v3 = vunpack.c.l.bf16 %v649_v2  ;;  %v871_v19 = vld [vmem:[%s2183_s7] sm:$0x1] }
 0x10c   : > { %v532_v24 = vsel %vm531_vm7, %v454_v18, %v448_v16  ;;  %v487_v28 = vrot.slane %v486_v21, 2  ;;  %v481_v29 = vrot.slane %v480_v22, 2  ;;  %v872_v20 = vunpack.c.l.bf16 %v871_v19 }
 0x10d   : > { %v534_v31 = vsel %vm533_vm10, %v460_v23, %v532_v24  ;;  %v477_v32 = vrot.slane %v476_v26, 1  ;;  %v471_v33 = vrot.slane %v470_v27, 1  ;;  %v654_v5 = vrot.slane %v650_v3, %v2063_v4 }
 0x10e   : > { %v488_v34 = vadd.f32 %v487_v28, %v486_v21  ;;  %v482_v35 = vadd.f32 %v481_v29, %v480_v22  ;;  %v536_v36 = vsel %vm535_vm11, %v466_v30, %v534_v31  ;;  %v876_v21 = vrot.slane %v872_v20, %v2063_v4 }
 0x10f   : > { %v478_v37 = vadd.f32 %v477_v32, %v476_v26  ;;  %v472_v38 = vadd.f32 %v471_v33, %v470_v27 }
 0x110   : > { %v489_v39 = vrot.slane %v488_v34, 1  ;;  %v483_v40 = vrot.slane %v482_v35, 1 }
 0x111   : > { %v538_v43 = vsel %vm537_vm12, %v472_v38, %v536_v36 }
 0x112   : > { %v484_v41 = vadd.f32 %v483_v40, %v482_v35  ;;  %v490_v42 = vadd.f32 %v489_v39, %v488_v34  ;;  %v540_v44 = vsel %vm539_vm13, %v478_v37, %v538_v43 }
 0x114   : > { %v542_v45 = vsel %vm541_vm14, %v484_v41, %v540_v44 }
 0x115   : > { %v544_v46 = vsel %vm543_vm15, %v490_v42, %v542_v45 }
 0x116   : > { %1345 = vmatmul.mubr.f32.vlgmr.msra.gmra.mrb[0].mxu0 %v544_v46 }
 0x117   : > { %1414 = vmatprep.mubr.msk.f32.mxu0 %vm1828_vm0, %v1829_v25  ;;  %1502 = vmatpush3.bf16.msra.mxu0 %v1153_v48 }
 0x118   : > { %1503 = vmatprep.subr.bf16.mxu0 %v1827_v1 }
 0x11b   : > { %1505 = vmatpush3.bf16.msra.mxu0 %v1230_v49 }
 0x11c   : > { %1506 = vmatprep.subr.bf16.mxu0 %v1827_v1 }
 0x11f   : > { %1508 = vmatpush3.bf16.msra.mxu0 %v1231_v50 }
 0x120   : > { %1509 = vmatprep.subr.bf16.mxu0 %v1827_v1 }
 0x123   : > { %1511 = vmatpush3.bf16.msra.mxu0 %v1232_v51 }
 0x124   : > { %1512 = vmatprep.subr.bf16.mxu0 %v1827_v1 }
 0x127   : > { %1514 = vmatpush3.bf16.msra.mxu0 %v1233_v52 }
 0x128   : > { %1515 = vmatprep.subr.bf16.mxu0 %v1827_v1 }
 0x12b   : > { %1517 = vmatpush3.bf16.msra.mxu0 %v1234_v53 }
 0x12c   : > { %1518 = vmatprep.subr.bf16.mxu0 %v1827_v1 }
 0x12f   : > { %1520 = vmatpush3.bf16.msra.mxu0 %v1235_v54 }
 0x130   : > { %1521 = vmatprep.subr.bf16.mxu0 %v1827_v1 }
 0x133   : > { %1523 = vmatpush3.bf16.msra.mxu0 %v1236_v58 }
 0x1e9   : > { %v612_v55 = vpop.f32.mrb[0].mxu0 }
 0x1ea   : > { %v616_v56 = vmul.f32 0.125, %v612_v55  ;;  %v1346_v57 = vpop.f32.mrb[1].mxu0 }
 0x1ec   : > { %1380 = vmatmul.mubr.f32.vlgmr.msra.gmra.mrb[0].mxu1 %v616_v56 }
 0x1ed   : > { %1449 = vmatprep.mubr.msk.f32.mxu1 %vm1828_vm0, %v1829_v25  ;;  %1526 = vmatpush3.bf16.msra.mxu1 %v1185_v59  ;;  %v1241_v25 = vld [vmem:[#allocation8 + $0x28] sm:$0xff]  }
 0x1ee   : > { %1527 = vmatprep.subr.bf16.mxu1 %v1827_v1 }
 0x1f1   : > { %1529 = vmatpush3.bf16.msra.mxu1 %v1237_v60 }
 0x1f2   : > { %1530 = vmatprep.subr.bf16.mxu1 %v1827_v1 }
 0x1f5   : > { %1532 = vmatpush3.bf16.msra.mxu1 %v1238_v61 }
 0x1f6   : > { %1533 = vmatprep.subr.bf16.mxu1 %v1827_v1 }
 0x1f9   : > { %1535 = vmatpush3.bf16.msra.mxu1 %v1239_v62 }
 0x1fa   : > { %1536 = vmatprep.subr.bf16.mxu1 %v1827_v1 }
 0x1fd   : > { %1538 = vmatpush3.bf16.msra.mxu1 %v1240_v63 }
 0x1fe   : > { %1539 = vmatprep.subr.bf16.mxu1 %v1827_v1 }
 0x201   : > { %1541 = vmatpush3.bf16.msra.mxu1 %v1241_v25 }
 0x202   : > { %1542 = vmatprep.subr.bf16.mxu1 %v1827_v1 }
 0x205   : > { %1544 = vmatpush3.bf16.msra.mxu1 %v1242_v0 }
 0x206   : > { %1545 = vmatprep.subr.bf16.mxu1 %v1827_v1  ;;  %v760_v1 = vld [vmem:[%s2181_s5] sm:$0x1] }
 0x207   : > { %v761_v12 = vunpack.c.l.bf16 %v760_v1 }
 0x209   : > { %1547 = vmatpush3.bf16.msra.mxu1 %v1243_v11  ;;  %v765_v13 = vrot.slane %v761_v12, %v2063_v4 }
 0x2bf   : > { %v721_v6 = vpop.f32.mrb[0].mxu1 }
 0x2c0   : > { %v722_v7 = vadd.f32 %v721_v6, %v654_v5  ;;  %v1381_v8 = vpop.f32.mrb[1].mxu1 }
 0x2c2   : > { %vm725_vm0 = vcmp.gt.f32.partialorder %v722_v7, 0.0  ;;  %v726_v9 = vmul.f32 0.01, %v722_v7 }
 0x2c4   : > { %v727_v10 = vsel %vm725_vm0, %v722_v7, %v726_v9 }
 0x2c5   : > { %1415 = vmatmul.mubr.f32.vlgmr.msra.gmra.mrb[2].mxu0 %v727_v10 }
 0x398   : > { %v832_v14 = vpop.f32.mrb[2].mxu0 }
 0x399   : > { %v833_v15 = vadd.f32 %v832_v14, %v765_v13  ;;  %v1416_v16 = vpop.f32.mrb[3].mxu0 }
 0x39b   : > { %vm836_vm1 = vcmp.gt.f32.partialorder %v833_v15, 0.0  ;;  %v837_v17 = vmul.f32 0.01, %v833_v15 }
 0x39d   : > { %v838_v18 = vsel %vm836_vm1, %v833_v15, %v837_v17 }
 0x39e   : > { %1450 = vmatmul.mubr.f32.vlgmr.msra.gmra.mrb[2].mxu1 %v838_v18 }
 0x471   : > { %v943_v22 = vpop.f32.mrb[2].mxu1 }
 0x472   : > { %v944_v23 = vadd.f32 %v943_v22, %v876_v21  ;;  %v1451_v24 = vpop.f32.mrb[3].mxu1 }
 0x474   : > { %947 = vst [vmem:[%s355_s24] sm:$0xff] %v944_v23 }
 0x475   : > { %1758 = shalt.err (!%p1755_p0)
}
 0x476   : > { %s1759_s14 = scalar_lea.hbm %s2134_s20, 128  ;;  %s1763_s13 = scalar_lea.hbm %s2184_s8, 256 }
 0x477   : > { %p1760_p10 = scmp.ne.s32.totalorder %s2134_s20, %s1759_s14  ;;  %p1764_p4 = scmp.lt.u32.totalorder %s2134_s20, %s2184_s8 }
 0x478   : > { %p1765_p12 = scmp.lt.u32.totalorder %s1763_s13, %s1759_s14  ;;  %p1767_p8 = scmp.lt.u32.totalorder %s1759_s14, %s2134_s20 }
 0x479   : > { %p1761_p2 = pnand %p1760_p10, %p2208_p11 }
 0x47a   : > { %p1766_p7 = por %p1765_p12, %p1764_p4 }
 0x47b   : > { %p1762_p3 = pneg %p1761_p2 }
 0x47c   : > { %p1768_p13 = por %p1767_p8, %p1766_p7 }
 0x47e   : > { %p1769_p1 = pnand %p1768_p13, %p1762_p3 }
 0x480   : > { %1772 = shalt.err (!%p1769_p1)
}
 0x481   : > { %1564 = dma.vmem_to_hbm [thread:$0]  (%p2208_p11), %s2136_s22, 128, %s2134_s20, %s949_s18  }
 0x482 PF: > { %s2209_s25 = sld [smem:[#allocation18_spill]]  ;;  %p1591_p6 = scmp.ge.s32.totalorder %s1819_s30, 2 }
 0x483   : > { %s974_s19 = sand.u32 1, %s1807_s27  }
 0x484   : > { %s975_s24 = scalar_lea.sflag [#allocation4], %s974_s19 }
 0x488   : > { %p2210_p9 = scmp.ne.s32.totalorder %s2209_s25, 0 }
 0x48a   : > { %p1580_p5 = pnand %p1591_p6, %p2210_p9 }
 0x48c   : > { %1802 = dma.done.wait (!%p1580_p5), %s975_s24, 128  }
 0x48d   : > { %1804 = vsyncadd (!%p1580_p5), %s975_s24, 4294967168  ;;  %s2211_s30 = sld [smem:[#allocation16_spill]]  ;;  %s2212_s29 = sld [smem:[#allocation15_spill]] }
 0x48e   : > { %s2213_s17 = sld [smem:[#allocation17_spill]]  ;;  %s2214_s27 = smov %s1811_s28 }
 0x493   : > { %p21_p0 = scmp.ge.s32.totalorder %s2211_s30, 4   ;;  %s2215_s28 = smov %s2212_s29 }
 0x494   : > { %s2216_s29 = smov %s2213_s17 }
 0x495   :  { %23 = sbr.rel (!%p21_p0) target bundleno = 6 (0x6), region = 104 }
 0x49c   :  { %980 = vsyncpa [#allocation3], 1 }
 0x49d   :  { %982 = vsyncpa [#allocation3 + $0x1], 1 }
 0x49e   :  { %983 = vsyncpa [#allocation6], 1 }
 0x49f   :  { %984 = vsyncpa [#allocation9], 1 }
 0x4a0   :  { %985 = vsyncpa [#allocation4], 1 }
 0x4a1   :  { %987 = vsyncpa [#allocation4 + $0x1], 1 }

</bundles_post_ra>
